<compile_context>
chip_gen: v7x
topology: tpu7x:2x2x1
jax: 0.10.0
libtpu: 0.0.40
codegen_flags: <defaults>
</compile_context>

<pallas_src>
import jax
import jax.numpy as jnp
import numpy as np
from jax.experimental import pallas as pl
from jax.experimental.pallas import tpu as pltpu


# --------------------------------------------------------------------------
# pltpu.roll direction probe (one tiny kernel, run once, eagerly): guarantees
# the tap shifts are built with the right rotation sign on any backend version.
# --------------------------------------------------------------------------
_ROLL_MATCHES_JNP = None


def _roll_matches_jnp():
    """True iff pltpu.roll(x, s, axis) == jnp.roll(x, s, axis)."""
    global _ROLL_MATCHES_JNP
    if _ROLL_MATCHES_JNP is None:
        def probe(x_ref, o_ref):
            o_ref[...] = pltpu.roll(x_ref[...], 3, axis=1)

        # ensure_compile_time_eval: the probe stays concrete/eager even if the
        # wrapper is ever constructed or called under a jax.jit trace.
        with jax.ensure_compile_time_eval():
            x = jnp.arange(8 * 256, dtype=jnp.float32).reshape(8, 256)
            y = np.asarray(
                pl.pallas_call(
                    probe,
                    out_shape=jax.ShapeDtypeStruct((8, 256), jnp.float32))(x))
            fwd = np.asarray(jnp.roll(x, 3, axis=1))
            bwd = np.asarray(jnp.roll(x, -3, axis=1))
        if np.array_equal(y, fwd):
            _ROLL_MATCHES_JNP = True
        elif np.array_equal(y, bwd):
            _ROLL_MATCHES_JNP = False
        else:
            raise RuntimeError("unexpected pltpu.roll semantics")
    return _ROLL_MATCHES_JNP


# --------------------------------------------------------------------------
# Fused kernel: sigma = BN(conv1x1(x)), then out[c, s] = sum_k sigma[k, c] *
# x[c, s + off_k] with zero padding, all in the (C, H*W) layout.
# --------------------------------------------------------------------------
def _make_fused_kernel(B, C, H, W, SC, OP, OPT):
    S = H * W
    K = 3
    # Kernel-level assumptions (kept next to the kernel — see review concern #2):
    # sigma's flattened 16x16 spatial index is reused as the output-channel
    # index, which requires S == C (i.e. group == 256, Ck == 1), and BN runs in
    # inference mode (running statistics folded into the 1x1 conv).
    assert S == C
    assert C % SC == 0
    assert OP >= K * K and OP % 8 == 0
    assert OPT % 128 == 0 and OPT >= OP
    taps = [(ki, kj) for ki in range(K) for kj in range(K)]
    matches = _roll_matches_jnp()

    def amt(delta, size):
        # rotation a with  pltpu.roll(x, a, axis)[..., i] == x[..., (i+delta) % size]
        return ((-delta) % size) if matches else (delta % size)

    def kernel(x_ref, w_ref, shift_ref, out_ref, sig_ref):
        # x_ref:     (B, C, S)   channels on sublanes, flat 16x16 spatial on lanes
        # w_ref:     (OP, C)     BN-folded 1x1-conv weight, 9 real rows padded to 16
        # shift_ref: (OP, 1)     BN shift column (zero-padded)
        # out_ref:   (B, C, S)
        # sig_ref:   (S, OPT)    VMEM scratch: adaptive weight per (channel, tap);
        #                        only lanes 0..8 are ever read back.

        # ---- per-tap validity masks, built ONCE (loop invariant) --------------
        lane = jax.lax.broadcasted_iota(jnp.int32, (1, S), 1)
        if (W & (W - 1)) == 0:
            ww = jnp.bitwise_and(lane, W - 1)
        else:
            ww = lane % W
        row_lo = lane >= W               # h - 1 >= 0
        row_hi = lane < (H - 1) * W      # h + 1 <= H - 1
        col_lo = ww >= 1                 # w - 1 >= 0
        col_hi = ww <= W - 2             # w + 1 <= W - 1

        tap_mask = []
        for (ki, kj) in taps:
            m = None
            if ki == 0:
                m = row_lo
            elif ki == K - 1:
                m = row_hi
            if kj == 0:
                m = col_lo if m is None else jnp.logical_and(m, col_lo)
            elif kj == K - 1:
                m = col_hi if m is None else jnp.logical_and(m, col_hi)
            tap_mask.append(m)           # center tap: None (no select at all)

        # Zero rows used to pad sigma to a 128-row tile before the XLU transpose.
        # Hoisted out of the sample loop (JAX does not CSE broadcasts).
        pad_rows = jnp.zeros((OPT - OP, S), jnp.float32)

        for b in range(B):
            # ---- sigma = BN(conv1x1(adpool(x))); adpool is identity at 16x16 --
            # Only 16 LHS rows are pushed through the MXU (vs 128 before).
            sigma = jnp.dot(w_ref[...], x_ref[b],
                            preferred_element_type=jnp.float32)         # (OP, S)
            sigma = sigma + shift_ref[...]                               # + BN shift
            # taps-on-lanes -> taps-per-channel; transpose padded to 128 lanes so
            # it stays on the proven XLU-tile-aligned path.
            sig_ref[...] = jnp.concatenate([sigma, pad_rows], axis=0).T  # (S, OPT)

            # ---- adaptive depthwise 3x3, strip-tiled over channels ------------
            for c0 in range(0, C, SC):
                base = x_ref[b, c0:c0 + SC, :]                           # (SC, S)
                sig_strip = sig_ref[c0:c0 + SC, :]                       # (SC, OPT)
                acc = None
                for k, (ki, kj) in enumerate(taps):
                    # per-channel weight of tap k: static lane slice (no roll),
                    # broadcast across the S spatial lanes by the multiply.
                    col = sig_strip[:, k:k + 1]                          # (SC, 1)

                    off = (ki - 1) * W + (kj - 1)
                    a_tap = amt(off, S)
                    shifted = base if a_tap == 0 else pltpu.roll(base, a_tap, axis=1)
                    m = tap_mask[k]
                    if m is not None:
                        shifted = jnp.where(m, shifted, 0.0)             # single select
                    term = shifted * col
                    acc = term if acc is None else acc + term
                out_ref[b, c0:c0 + SC, :] = acc

    return kernel


# --------------------------------------------------------------------------
# AClayer in JAX/Pallas.
# --------------------------------------------------------------------------
class AClayerPallas:
    OP = 16      # 9 real taps padded to a sublane-aligned 16-row matmul LHS
    OPT = 128    # lane width of the transposed weight scratch (XLU-tile aligned)
    SC = 32      # channel strip size: accumulator = 8 vregs, no spills

    def __init__(self, in_channels, p, kernel_size, group, key):
        assert kernel_size == 3  # torch forward hardcodes F.unfold(kernel_size=3, padding=1)
        assert in_channels % group == 0
        self.in_channels = in_channels
        self.group = group
        self.kernel_size = kernel_size
        self.p = p  # unused by the forward pass (kept for parity)
        self.Ck = in_channels // group
        O = self.Ck * kernel_size * kernel_size

        _roll_matches_jnp()  # resolve the roll sign eagerly, at construction time

        k1, k2, k3, k4, k5 = jax.random.split(key, 5)
        bound = 1.0 / float(np.sqrt(in_channels))
        # conv1: 1x1, bias=False — deterministic synthetic init
        self.conv_w = jax.random.uniform(k1, (O, in_channels), jnp.float32, -bound, bound)
        # BatchNorm2d params/buffers (inference-mode running statistics).
        # TODO(synk): training-mode BN would use per-batch statistics instead.
        self.bn_gamma = 1.0 + 0.1 * jax.random.normal(k2, (O,), jnp.float32)
        self.bn_beta = 0.1 * jax.random.normal(k3, (O,), jnp.float32)
        self.bn_mean = 0.05 * jax.random.normal(k4, (O,), jnp.float32)
        self.bn_var = jnp.abs(1.0 + 0.1 * jax.random.normal(k5, (O,), jnp.float32))
        self.bn_eps = 1e-5

        # Fold BN into the 1x1 conv; pad only to OP=16 rows (padded rows are
        # never read back: only tap columns 0..8 are used in the kernel).
        scale = self.bn_gamma / jnp.sqrt(self.bn_var + self.bn_eps)
        w_scaled = self.conv_w * scale[:, None]                          # (O, C)
        shift = self.bn_beta - self.bn_mean * scale                      # (O,)
        self.w16 = jnp.zeros((self.OP, in_channels), jnp.float32).at[:O].set(w_scaled)
        self.shift_col = jnp.zeros((self.OP, 1), jnp.float32).at[:O, 0].set(shift)

        self._calls = {}  # compiled pallas_call wrappers keyed by input shape

    @staticmethod
    def _samples_per_step(N):
        # Largest power-of-two block of samples (<= 8) dividing N, capped so the
        # "parallel" grid keeps >= 2 steps whenever N >= 2 (both v7x TensorCores
        # stay busy) while amortizing per-grid-step overhead for larger batches.
        B = 1
        while B < 8 and N % (2 * B) == 0:
            B *= 2
        if N >= 2:
            B = max(1, min(B, N // 2))
        return B

    def _fused_call(self, N, C, H, W):
        key = (N, C, H, W)
        if key not in self._calls:
            S = H * W
            B = self._samples_per_step(N)
            kern = _make_fused_kernel(B, C, H, W, self.SC, self.OP, self.OPT)
            self._calls[key] = pl.pallas_call(
                kern,
                out_shape=jax.ShapeDtypeStruct((N, C, S), jnp.float32),
                grid_spec=pltpu.PrefetchScalarGridSpec(
                    num_scalar_prefetch=0,
                    grid=(N // B,),
                    in_specs=[
                        pl.BlockSpec((B, C, S), lambda n: (n, 0, 0)),
                        pl.BlockSpec((self.OP, C), lambda n: (0, 0)),
                        pl.BlockSpec((self.OP, 1), lambda n: (0, 0)),
                    ],
                    out_specs=pl.BlockSpec((B, C, S), lambda n: (n, 0, 0)),
                    scratch_shapes=[pltpu.VMEM((S, self.OPT), jnp.float32)],
                ),
                compiler_params=pltpu.CompilerParams(
                    dimension_semantics=("parallel",),
                ),
            )
        return self._calls[key]

    def __call__(self, x):
        N, C, H, W = x.shape
        assert C == self.in_channels
        # The torch forward's broadcast is only valid for group == 16*16; the
        # fused kernel additionally assumes Ck == 1 and a 16x16 input (the
        # adaptive average pool is then the identity).
        assert self.group == 16 * 16
        assert self.Ck == 1
        assert (H, W) == (16, 16)
        # TODO(synk): non-16x16 inputs would need the adaptive average pool
        # feeding the sigma matmul; Ck > 1 needs a sigma->weight regroup in-kernel.

        x_cs = x.reshape(N, C, H * W)  # free reshape: NCHW -> (N, C, HW)
        out = self._fused_call(N, C, H, W)(x_cs, self.w16, self.shift_col)
        return out.reshape(N, C, H, W)


# --------------------------------------------------------------------------
# Pure-JAX transliteration of the PyTorch forward (for verification).
# --------------------------------------------------------------------------
def adaptive_avg_pool_16(x):
    """nn.AdaptiveAvgPool2d((16, 16)) for H, W that are multiples of 16."""
    N, C, H, W = x.shape
    if (H, W) == (16, 16):
        return x
    assert H % 16 == 0 and W % 16 == 0
    return x.reshape(N, C, 16, H // 16, 16, W // 16).mean(axis=(3, 5))


def reference_forward(x, layer):
    N, C, H, W = x.shape
    K, G = layer.kernel_size, layer.group
    Ck = C // G
    xp = adaptive_avg_pool_16(x)
    sigma = jnp.einsum('oc,nchw->nohw', layer.conv_w, xp)
    scale = layer.bn_gamma / jnp.sqrt(layer.bn_var + layer.bn_eps)
    shift = layer.bn_beta - layer.bn_mean * scale
    sigma = sigma * scale[None, :, None, None] + shift[None, :, None, None]
    # F.unfold(x, 3, padding=1): rows ordered c*9 + (ki*3 + kj)
    xpad = jnp.pad(x, ((0, 0), (0, 0), (1, 1), (1, 1)))
    taps = [xpad[:, :, ki:ki + H, kj:kj + W].reshape(N, C, H * W)
            for ki in range(3) for kj in range(3)]
    xu = jnp.stack(taps, axis=2)                                  # (N, C, 9, HW)
    xg = (jnp.transpose(xu, (1, 0, 2, 3))
             .reshape(G, Ck, N, K * K, H * W)
             .transpose(2, 0, 1, 3, 4))                           # (N, G, Ck, 9, HW)
    n_, cw, h1, w1 = sigma.shape
    sg = sigma.reshape(N, 1, cw, h1 * w1)
    sg = (jnp.transpose(sg, (2, 0, 1, 3))
             .reshape(cw // (K * K), K * K, N, 1, h1 * w1)
             .transpose(2, 4, 0, 1, 3))                           # (N, 256, Ck, 9, 1)
    return jnp.sum(xg * sg, axis=3).reshape(N, C, H, W)


if __name__ == "__main__":
    in_channels, p, kernel_size, group = 256, 2, 3, 256
    N, H, W = 2, 16, 16

    key = jax.random.PRNGKey(0)
    kx, kp = jax.random.split(key)
    layer = AClayerPallas(in_channels, p, kernel_size, group, kp)
    x = jax.random.normal(kx, (N, in_channels, H, W), jnp.float32)

    out = jax.block_until_ready(layer(x))
    ref = jax.block_until_ready(reference_forward(x, layer))

    assert out.shape == (N, in_channels, H, W)
    np.testing.assert_allclose(np.asarray(out), np.asarray(ref), rtol=2e-2, atol=2e-2)
    print("KERNEL_OK")
</pallas_src>

<mosaic_0001>
module attributes {stable_mosaic.version = 11 : i64} {
  func.func @probe(%arg0: memref<8x256xf32, #tpu.memory_space<vmem>>, %arg1: memref<8x256xf32, #tpu.memory_space<vmem>>) attributes {dimension_semantics = [], scalar_prefetch = 0 : i64, scratch_operands = 0 : i64, tpu.core_type = #tpu.core_type<tc>} {
    %c0 = arith.constant 0 : index
    %c0_0 = arith.constant 0 : index
    %0 = vector.load %arg0[%c0, %c0_0] : memref<8x256xf32, #tpu.memory_space<vmem>>, vector<8x256xf32>
    %c3_i32 = arith.constant 3 : i32
    %1 = tpu.dynamic_rotate %0 by %c3_i32 dim 1 : vector<8x256xf32>, i32 -> vector<8x256xf32>
    %c0_1 = arith.constant 0 : index
    %c0_2 = arith.constant 0 : index
    %2 = vector.load %arg1[%c0_1, %c0_2] : memref<8x256xf32, #tpu.memory_space<vmem>>, vector<8x256xf32>
    tpu.vector_store %arg1[%c0_1, %c0_2], %1 {strides = array<i32>} : memref<8x256xf32, #tpu.memory_space<vmem>>, vector<8x256xf32>,
    return
  }
}

</mosaic_0001>

<bundles_post_ra>
// kernel: tpu_custom_call.1
= control target key start
LH: loop header
LB: loop body
LE: loop exit
PB: predicated region body
PF: predicated region fallthrough
CT: control target
= control target key end

     0   :  { %6 = vsyncpa [#allocation3], 0  ;;  %s137_s0 = inlined_call_operand.hbm [shape: f32[8,256], index: 0, kind: input, shape index: {}]   ;;  %s138_s1 = inlined_call_operand.hbm [shape: f32[8,256], index: 1, kind: output, shape index: {}]  }
   0x1   :  { %7 = vsyncpa [#allocation4], 0  ;;  %s100_s6 = smov [#allocation2]   ;;  %s52_s10 = scalar_lea.hbm %s137_s0, 256 }
   0x2   :  { %s14_s7 = sshll.u32 %s100_s6, 4  ;;  %p53_p0 = scmp.ne.s32.totalorder %s137_s0, %s52_s10  ;;  %s15_s7 = int_to_ptr.vmem [resolvable:$true] %s14_s7 }
   0x3   :  { %p56_p1 = scmp.lt.u32.totalorder %s52_s10, %s137_s0 }
   0x5   :  { %p58_p2 = pnand %p56_p1, %p53_p0 }
   0x7   :  { %61 = shalt.err (!%p58_p2)
}
   0x8   :  { %s62_s15 = scalar_lea.vmem %s15_s7, 256  ;;  %p67_p4 = scmp.lt.s32.totalorder %s15_s7, %s15_s7 }
   0x9   :  { %p63_p3 = scmp.ne.s32.totalorder %s15_s7, %s62_s15  ;;  %p68_p5 = scmp.lt.s32.totalorder %s62_s15, %s62_s15 }
   0xb   :  { %p69_p6 = por %p68_p5, %p67_p4 }
   0xd   :  { %p70_p7 = pnand %p69_p6, %p63_p3 }
   0xf   :  { %73 = shalt.err (!%p70_p7)
}
  0x10   :  { %17 = dma.hbm_to_vmem [thread:$0]  %s137_s0, 256, %s15_s7, [#allocation3]  }
  0x11   :  { %96 = dma.done.wait [#allocation3], 256  }
  0x12   :  { %97 = vsyncadd [#allocation3], 4294967040  ;;  %v21_v0 = vld [vmem:[#allocation2] sm:$0xff]  ;;  %s101_s18 = smov 3   ;;  %v22_v1 = vld [vmem:[#allocation2 + $0x8] sm:$0xff]  ;;  %v27_v2 = vlaneseq  ;;  %s102_s19 = smov [#allocation5]  }
  0x13   :  { %23 = vrot.lane.b32.xlu0 %v21_v0, %s101_s18  ;;  %s40_s20 = sshll.u32 %s102_s19, 4  ;;  %s41_s20 = int_to_ptr.vmem [resolvable:$true] %s40_s20 }
  0x14   :  { %v28_v3 = vand.u32 127, %v27_v2  ;;  %s74_s0 = scalar_lea.vmem %s41_s20, 256  ;;  %p79_p9 = scmp.lt.s32.totalorder %s41_s20, %s41_s20 }
  0x15   :  { %p75_p8 = scmp.ne.s32.totalorder %s41_s20, %s74_s0  ;;  %p80_p10 = scmp.lt.s32.totalorder %s74_s0, %s74_s0 }
  0x16   :  { %vm29_vm0 = vcmp.lt.s32.totalorder %v28_v3, 3 }
  0x17   :  { %25 = vrot.lane.b32.xlu0 %v22_v1, %s101_s18  ;;  %p81_p11 = por %p80_p10, %p79_p9 }
  0x19   :  { %p82_p12 = pnand %p81_p11, %p75_p8 }
  0x85   :  { %v24_v4 = vpop.permute.xlu0 %23 }
  0x89   :  { %v26_v5 = vpop.permute.xlu0 %25 }
  0x8a   :  { %v30_v6 = vsel %vm29_vm0, %v24_v4, %v26_v5  ;;  %v31_v7 = vsel %vm29_vm0, %v26_v5, %v24_v4 }
  0x8b   :  { %32 = vst [vmem:[#allocation5] sm:$0xff] %v31_v7  ;;  %33 = vst [vmem:[#allocation5 + $0x8] sm:$0xff] %v30_v6 }
  0x8c   :  { %85 = shalt.err (!%p82_p12)
}
  0x8d   :  { %s86_s23 = scalar_lea.hbm %s138_s1, 256 }
  0x8e   :  { %p87_p13 = scmp.ne.s32.totalorder %s138_s1, %s86_s23  ;;  %p90_p0 = scmp.lt.u32.totalorder %s86_s23, %s138_s1 }
  0x90   :  { %p92_p1 = pnand %p90_p0, %p87_p13 }
  0x92   :  { %95 = shalt.err (!%p92_p1)
}
  0x93   :  { %43 = dma.vmem_to_hbm [thread:$0]  %s41_s20, 256, %s138_s1, [#allocation4]  }
  0x94   :  { %98 = dma.done.wait [#allocation4], 256  }
  0x95   :  { %99 = vsyncadd [#allocation4], 4294967040 }
  0x96   :  { %47 = vsyncpa [#allocation3], 1 }
  0x97   :  { %48 = vsyncpa [#allocation4], 1 }

</bundles_post_ra>
